<compile_context>
chip_gen: v7x
topology: tpu7x:2x2x1
jax: 0.10.0
libtpu: 0.0.40
codegen_flags: <defaults>
</compile_context>

<pallas_src>
import functools

import jax
import jax.numpy as jnp
from jax import lax
from jax.experimental import pallas as pl
from jax.experimental.pallas import tpu as pltpu

LANES = 128
MAX_BLOCK_BYTES = 1 << 20            # ~1 MiB per input block buffer
MAX_BLOCK_ELEMS_1D = MAX_BLOCK_BYTES // 4
VMEM_LIMIT_BYTES = 32 * 1024 * 1024
NUM_CORES = 2                        # v7x TCs per chip; harmless on 1-TC chips


def _pick_block_rows(rows, itemsize):
    """Whole array if it fits, else a ~1 MiB row-block (multiple of 16)."""
    max_rows = max(16, (MAX_BLOCK_BYTES // (LANES * itemsize)) // 16 * 16)
    return rows if rows <= max_rows else max_rows


def _reduce_kernel(params_ref, pos_ref, neg_ref, out_ref, acc_ref, *,
                   rows, block_rows, acc_rows, blocks_per_core):
    """Streaming hinge sum. acc_ref is a small vreg-shaped VMEM accumulator."""
    c = pl.program_id(0)                     # core-split axis ("parallel")
    i = pl.program_id(1)                     # streaming axis ("arbitrary")
    last = pl.num_programs(1) - 1

    @pl.when(i == 0)
    def _init():
        acc_ref[...] = jnp.zeros_like(acc_ref)

    inv_t = params_ref[0]
    margin = params_ref[1]

    # Unclamped logical block index: the index_map clamps the DMA so it never
    # walks past the array; here we decide how much of the tile is valid.
    block_idx = c * blocks_per_core + i
    row_start = block_idx * block_rows
    rows_left = rows - row_start             # <=0: fully OOB, <block_rows: partial

    pos = pos_ref[...].astype(jnp.float32)
    neg = neg_ref[...].astype(jnp.float32)
    # margin - pos/T + neg/T  ==  margin + (neg - pos) * (1/T)
    loss = jnp.maximum(margin + (neg - pos) * inv_t, 0.0)

    @pl.when(rows_left >= block_rows)        # interior tile: unmasked VPU fold
    def _full():
        acc_ref[...] += loss.reshape(-1, acc_rows, LANES).sum(axis=0)

    @pl.when(jnp.logical_and(rows_left > 0, rows_left < block_rows))
    def _partial():                          # ragged last tile: row-level mask
        r = lax.broadcasted_iota(jnp.int32, loss.shape, 0)
        masked = jnp.where(r < rows_left, loss, 0.0)   # where(), not mul: kills NaN garbage
        acc_ref[...] += masked.reshape(-1, acc_rows, LANES).sum(axis=0)

    @pl.when(i == last)                      # single XLU reduce + store, once
    def _finalize():
        out_ref[...] = jnp.sum(acc_ref[...]).reshape(1, 1, 1)


def _elementwise_kernel(params_ref, pos_ref, neg_ref, out_ref):
    inv_t = params_ref[0]
    margin = params_ref[1]
    pos = pos_ref[...].astype(jnp.float32)
    neg = neg_ref[...].astype(jnp.float32)
    loss = jnp.maximum(margin + (neg - pos) * inv_t, 0.0)
    out_ref[...] = loss.astype(out_ref.dtype)


def _hinge_sum_2d(pos2d, neg2d, params, in_itemsize):
    """Lane-dense streaming hinge sum over a (rows, 128) view -> f32 scalar."""
    rows = pos2d.shape[0]
    block_rows = _pick_block_rows(rows, in_itemsize)
    acc_rows = 8 if block_rows % 8 == 0 else block_rows
    total_blocks = pl.cdiv(rows, block_rows)
    num_cores = min(NUM_CORES, total_blocks)
    blocks_per_core = pl.cdiv(total_blocks, num_cores)

    def in_map(c, i):
        # Clamp so the auto-pipelined DMA never reads out of bounds; clamped
        # (duplicate) blocks are skipped in-kernel via rows_left <= 0.
        return (jnp.minimum(c * blocks_per_core + i, total_blocks - 1), 0)

    data_spec = pl.BlockSpec((block_rows, LANES), in_map)
    smem_spec = pl.BlockSpec(memory_space=pltpu.MemorySpace.SMEM)

    kernel = functools.partial(
        _reduce_kernel, rows=rows, block_rows=block_rows,
        acc_rows=acc_rows, blocks_per_core=blocks_per_core)

    n_elems = rows * LANES
    cost = pl.CostEstimate(
        flops=5 * n_elems, transcendentals=0,
        bytes_accessed=2 * n_elems * in_itemsize + 4 * num_cores)

    partials = pl.pallas_call(
        kernel,
        out_shape=jax.ShapeDtypeStruct((num_cores, 1, 1), jnp.float32),
        grid=(num_cores, blocks_per_core),
        in_specs=[smem_spec, data_spec, data_spec],
        out_specs=pl.BlockSpec((1, 1, 1), lambda c, i: (c, 0, 0)),
        scratch_shapes=[pltpu.VMEM((acc_rows, LANES), jnp.float32)],
        compiler_params=pltpu.CompilerParams(
            dimension_semantics=("parallel", "arbitrary"),
            vmem_limit_bytes=VMEM_LIMIT_BYTES),
        cost_estimate=cost,
    )(params, pos2d, neg2d)
    return jnp.sum(partials)


def ranking_loss(positive_scores, negative_scores, *, margin=0.5,
                 reduction="mean", temperature=1.0):
    """Pallas implementation of RankingLoss.forward."""
    assert positive_scores.shape == negative_scores.shape
    orig_shape = positive_scores.shape
    out_dtype = jnp.result_type(positive_scores.dtype, negative_scores.dtype)

    pos = positive_scores.reshape(-1)
    neg = negative_scores.reshape(-1)
    n = pos.shape[0]
    in_itemsize = max(jnp.dtype(positive_scores.dtype).itemsize,
                      jnp.dtype(negative_scores.dtype).itemsize)

    if n == 0:  # empty-input contract (handled in plain JAX)
        if reduction == "sum":
            return jnp.zeros((), out_dtype)
        if reduction == "mean":
            return jnp.full((), jnp.nan, out_dtype)
        return jnp.zeros(orig_shape, out_dtype)

    inv_t = 1.0 / float(temperature)
    params = jnp.array([inv_t, float(margin)], jnp.float32)  # SMEM scalars

    if reduction in ("mean", "sum"):
        n_main = (n // LANES) * LANES
        total = jnp.zeros((), jnp.float32)
        if n_main > 0:
            rows = n_main // LANES
            if n_main == n:
                pos2d = pos.reshape(rows, LANES)       # zero-copy lane-dense view
                neg2d = neg.reshape(rows, LANES)
            else:
                # Ragged N: lane-dense aligned prefix (slice is one extra XLA pass).
                pos2d = lax.slice(pos, (0,), (n_main,)).reshape(rows, LANES)
                neg2d = lax.slice(neg, (0,), (n_main,)).reshape(rows, LANES)
            total = _hinge_sum_2d(pos2d, neg2d, params, in_itemsize)
        if n_main < n:
            # <128-element tail: tiny JAX correction added to the kernel partial.
            tp = lax.slice(pos, (n_main,), (n,)).astype(jnp.float32)
            tn = lax.slice(neg, (n_main,), (n,)).astype(jnp.float32)
            total = total + jnp.sum(
                jnp.maximum(float(margin) + (tn - tp) * inv_t, 0.0))
        if reduction == "mean":
            total = total / jnp.float32(n)
        return total.astype(out_dtype)

    # ---------------- reduction == 'none': elementwise output ----------------
    out_itemsize = jnp.dtype(out_dtype).itemsize
    if n % LANES == 0:
        rows = n // LANES
        block_rows = _pick_block_rows(rows, max(in_itemsize, out_itemsize))
        pos2d = pos.reshape(rows, LANES)
        neg2d = neg.reshape(rows, LANES)
        data_spec = pl.BlockSpec((block_rows, LANES), lambda i: (i, 0))
        grid = (pl.cdiv(rows, block_rows),)
    else:
        # Ragged N: keep the (1, N) lane-tiled view. Prefix+tail+concatenate
        # would add a full extra pass over the output; the partial tail block
        # is handled by Pallas's masked partial-block writeback.
        pos2d = pos.reshape(1, n)
        neg2d = neg.reshape(1, n)
        if n < LANES:
            block_cols = n                             # full-dim block, no OOB
        else:
            block_cols = min(MAX_BLOCK_ELEMS_1D, (n // LANES) * LANES)
        data_spec = pl.BlockSpec((1, block_cols), lambda i: (0, i))
        grid = (pl.cdiv(n, block_cols),)

    smem_spec = pl.BlockSpec(memory_space=pltpu.MemorySpace.SMEM)
    cost = pl.CostEstimate(flops=4 * n, transcendentals=0,
                           bytes_accessed=2 * n * in_itemsize + n * out_itemsize)
    out = pl.pallas_call(
        _elementwise_kernel,
        out_shape=jax.ShapeDtypeStruct(pos2d.shape, out_dtype),
        grid=grid,
        in_specs=[smem_spec, data_spec, data_spec],
        out_specs=data_spec,
        compiler_params=pltpu.CompilerParams(
            dimension_semantics=("parallel",),
            vmem_limit_bytes=VMEM_LIMIT_BYTES),
        cost_estimate=cost,
    )(params, pos2d, neg2d)
    return out.reshape(orig_shape)


def _reference(pos, neg, margin, reduction, temperature):
    pos = pos / temperature
    neg = neg / temperature
    loss = jnp.maximum(margin - pos + neg, 0.0)
    if reduction == "mean":
        return loss.mean()
    if reduction == "sum":
        return loss.sum()
    return loss


if __name__ == "__main__":
    key = jax.random.PRNGKey(0)
    margin, temperature = 0.5, 2.0
    ok = True

    # Shapes chosen to exercise every code path:
    #   200    -> ragged: 128-elem lane-dense prefix + 72-elem JAX tail ('none' keeps (1,N))
    #   512    -> aligned, single exact block (rows=4)
    #   1000   -> ragged: rows=7 prefix (acc_rows==block_rows path) + 104-elem tail
    #   524800 -> aligned, rows=4100: multi-block, dual-core split, partial last
    #             block mask, and one clamped (skipped) OOB block on core 1.
    test_sizes = (200, 512, 1000, 524800)

    for idx, n in enumerate(test_sizes):
        k1, k2 = jax.random.split(jax.random.fold_in(key, idx))
        p = jax.random.normal(k1, (n,), jnp.float32)
        q = jax.random.normal(k2, (n,), jnp.float32)
        reductions = ("mean", "sum") if n > 10000 else ("mean", "sum", "none")
        for reduction in reductions:
            out = ranking_loss(p, q, margin=margin, reduction=reduction,
                               temperature=temperature)
            out = jax.block_until_ready(out)
            ref = _reference(p, q, margin, reduction, temperature)
            if not jnp.allclose(out, ref, atol=1e-5, rtol=1e-5):
                ok = False
                print("MISMATCH:", reduction, n)

    # bf16 inputs: DMA'd natively, upcast to f32 inside the kernel.
    k1, k2 = jax.random.split(jax.random.fold_in(key, 99))
    pb = jax.random.normal(k1, (512,), jnp.float32).astype(jnp.bfloat16)
    qb = jax.random.normal(k2, (512,), jnp.float32).astype(jnp.bfloat16)
    out = jax.block_until_ready(
        ranking_loss(pb, qb, margin=margin, reduction="mean",
                     temperature=temperature))
    ref = _reference(pb.astype(jnp.float32), qb.astype(jnp.float32),
                     margin, "mean", temperature).astype(jnp.bfloat16)
    if not jnp.allclose(out.astype(jnp.float32), ref.astype(jnp.float32),
                        atol=2e-2, rtol=2e-2):
        ok = False
        print("MISMATCH: bf16 mean")

    if ok:
        print("KERNEL_OK")
</pallas_src>

<mosaic_0001>
module attributes {stable_mosaic.version = 11 : i64} {
  func.func @_reduce_kernel(%arg0: i32, %arg1: i32, %arg2: memref<2xf32, #tpu.memory_space<smem>>, %arg3: memref<1x128xf32, #tpu.memory_space<vmem>>, %arg4: memref<1x128xf32, #tpu.memory_space<vmem>>, %arg5: memref<1x1x1xf32, #tpu.memory_space<vmem>>, %arg6: memref<1x128xf32, #tpu.memory_space<vmem>>) attributes {dimension_semantics = [#tpu.dimension_semantics<parallel>, #tpu.dimension_semantics<arbitrary>], iteration_bounds = array<i64: 1, 1>, scalar_prefetch = 0 : i64, scratch_operands = 1 : i64, tpu.core_type = #tpu.core_type<tc>, window_params = [{transform_indices = @transform_0, window_bounds = array<i64: 2>}, {transform_indices = @transform_1, window_bounds = array<i64: 1, 128>}, {transform_indices = @transform_2, window_bounds = array<i64: 1, 128>}, {transform_indices = @transform_3, window_bounds = array<i64: 1, 1, 1>}]} {
    %c0_i32 = arith.constant 0 : i32
    %0 = arith.cmpi eq, %arg1, %c0_i32 : i32
    %1 = arith.extui %0 : i1 to i32
    %c0_i32_0 = arith.constant 0 : i32
    %2 = arith.cmpi ne, %1, %c0_i32_0 : i32
    scf.if %2 {
      %cst_14 = arith.constant 0.000000e+00 : f32
      %29 = vector.broadcast %cst_14 : f32 to vector<1x128xf32>
      %c0_15 = arith.constant 0 : index
      %c0_16 = arith.constant 0 : index
      %30 = vector.load %arg6[%c0_15, %c0_16] : memref<1x128xf32, #tpu.memory_space<vmem>>, vector<1x128xf32>
      tpu.vector_store %arg6[%c0_15, %c0_16], %29 {strides = array<i32>} : memref<1x128xf32, #tpu.memory_space<vmem>>, vector<1x128xf32>,
    } else {
    }
    %c0 = arith.constant 0 : index
    %3 = memref.load %arg2[%c0] : memref<2xf32, #tpu.memory_space<smem>>
    %c1 = arith.constant 1 : index
    %4 = memref.load %arg2[%c1] : memref<2xf32, #tpu.memory_space<smem>>
    %c1_i32 = arith.constant 1 : i32
    %5 = arith.muli %arg0, %c1_i32 : i32
    %6 = arith.addi %5, %arg1 : i32
    %c1_i32_1 = arith.constant 1 : i32
    %7 = arith.muli %6, %c1_i32_1 : i32
    %c1_i32_2 = arith.constant 1 : i32
    %8 = arith.subi %c1_i32_2, %7 : i32
    %c0_3 = arith.constant 0 : index
    %c0_4 = arith.constant 0 : index
    %9 = vector.load %arg3[%c0_3, %c0_4] : memref<1x128xf32, #tpu.memory_space<vmem>>, vector<1x128xf32>
    %c0_5 = arith.constant 0 : index
    %c0_6 = arith.constant 0 : index
    %10 = vector.load %arg4[%c0_5, %c0_6] : memref<1x128xf32, #tpu.memory_space<vmem>>, vector<1x128xf32>
    %11 = arith.subf %10, %9 : vector<1x128xf32>
    %12 = vector.broadcast %3 : f32 to vector<1x128xf32>
    %13 = arith.mulf %11, %12 : vector<1x128xf32>
    %14 = vector.broadcast %4 : f32 to vector<1x128xf32>
    %15 = arith.addf %14, %13 : vector<1x128xf32>
    %cst = arith.constant 0.000000e+00 : f32
    %16 = vector.broadcast %cst : f32 to vector<1x128xf32>
    %17 = arith.maximumf %15, %16 : vector<1x128xf32>
    %c1_i32_7 = arith.constant 1 : i32
    %18 = arith.cmpi sge, %8, %c1_i32_7 : i32
    %19 = arith.extui %18 : i1 to i32
    %c0_i32_8 = arith.constant 0 : i32
    %20 = arith.cmpi ne, %19, %c0_i32_8 : i32
    scf.if %20 {
      %c0_14 = arith.constant 0 : index
      %c0_15 = arith.constant 0 : index
      %29 = vector.load %arg6[%c0_14, %c0_15] : memref<1x128xf32, #tpu.memory_space<vmem>>, vector<1x128xf32>
      %30 = vector.shape_cast %17 : vector<1x128xf32> to vector<1x1x128xf32>
      %cst_16 = arith.constant dense<0.000000e+00> : vector<1x128xf32>
      %31 = vector.multi_reduction <add>, %30, %cst_16 [0] : vector<1x1x128xf32> to vector<1x128xf32>
      %32 = arith.addf %29, %31 : vector<1x128xf32>
      %c0_17 = arith.constant 0 : index
      %c0_18 = arith.constant 0 : index
      %33 = vector.load %arg6[%c0_17, %c0_18] : memref<1x128xf32, #tpu.memory_space<vmem>>, vector<1x128xf32>
      tpu.vector_store %arg6[%c0_17, %c0_18], %32 {strides = array<i32>} : memref<1x128xf32, #tpu.memory_space<vmem>>, vector<1x128xf32>,
    } else {
    }
    %c0_i32_9 = arith.constant 0 : i32
    %21 = arith.cmpi sgt, %8, %c0_i32_9 : i32
    %c1_i32_10 = arith.constant 1 : i32
    %22 = arith.cmpi slt, %8, %c1_i32_10 : i32
    %23 = arith.andi %21, %22 : i1
    %24 = arith.extui %23 : i1 to i32
    %c0_i32_11 = arith.constant 0 : i32
    %25 = arith.cmpi ne, %24, %c0_i32_11 : i32
    scf.if %25 {
      %29 = tpu.iota {dimensions = array<i32: 0>} : vector<1x128xi32>
      %30 = vector.broadcast %8 : i32 to vector<1x128xi32>
      %31 = arith.cmpi slt, %29, %30 : vector<1x128xi32>
      %cst_14 = arith.constant 0.000000e+00 : f32
      %32 = vector.broadcast %cst_14 : f32 to vector<1x128xf32>
      %33 = arith.select %31, %17, %32 : vector<1x128xi1>, vector<1x128xf32>
      %c0_15 = arith.constant 0 : index
      %c0_16 = arith.constant 0 : index
      %34 = vector.load %arg6[%c0_15, %c0_16] : memref<1x128xf32, #tpu.memory_space<vmem>>, vector<1x128xf32>
      %35 = vector.shape_cast %33 : vector<1x128xf32> to vector<1x1x128xf32>
      %cst_17 = arith.constant dense<0.000000e+00> : vector<1x128xf32>
      %36 = vector.multi_reduction <add>, %35, %cst_17 [0] : vector<1x1x128xf32> to vector<1x128xf32>
      %37 = arith.addf %34, %36 : vector<1x128xf32>
      %c0_18 = arith.constant 0 : index
      %c0_19 = arith.constant 0 : index
      %38 = vector.load %arg6[%c0_18, %c0_19] : memref<1x128xf32, #tpu.memory_space<vmem>>, vector<1x128xf32>
      tpu.vector_store %arg6[%c0_18, %c0_19], %37 {strides = array<i32>} : memref<1x128xf32, #tpu.memory_space<vmem>>, vector<1x128xf32>,
    } else {
    }
    %c0_i32_12 = arith.constant 0 : i32
    %26 = arith.cmpi eq, %arg1, %c0_i32_12 : i32
    %27 = arith.extui %26 : i1 to i32
    %c0_i32_13 = arith.constant 0 : i32
    %28 = arith.cmpi ne, %27, %c0_i32_13 : i32
    scf.if %28 {
      %c0_14 = arith.constant 0 : index
      %c0_15 = arith.constant 0 : index
      %29 = vector.load %arg6[%c0_14, %c0_15] : memref<1x128xf32, #tpu.memory_space<vmem>>, vector<1x128xf32>
      %30 = vector.shape_cast %29 : vector<1x128xf32> to vector<1x1x128xf32>
      %cst_16 = arith.constant dense<0.000000e+00> : vector<1xf32>
      %31 = vector.multi_reduction <add>, %30, %cst_16 [1, 2] : vector<1x1x128xf32> to vector<1xf32>
      %32 = vector.shape_cast %31 : vector<1xf32> to vector<1x1x1xf32>
      %33 = vector.extract %32[0, 0, 0] : f32 from vector<1x1x1xf32>
      %34 = vector.broadcast %33 : f32 to vector<1x1x1xf32>
      %c0_17 = arith.constant 0 : index
      %c0_18 = arith.constant 0 : index
      %c0_19 = arith.constant 0 : index
      %35 = vector.load %arg5[%c0_17, %c0_18, %c0_19] : memref<1x1x1xf32, #tpu.memory_space<vmem>>, vector<1x1x1xf32>
      tpu.vector_store %arg5[%c0_17, %c0_18, %c0_19], %34 {strides = array<i32>} : memref<1x1x1xf32, #tpu.memory_space<vmem>>, vector<1x1x1xf32>,
    } else {
    }
    return
  }
  func.func @transform_0(%arg0: i32, %arg1: i32) -> i32 {
    %c0_i32 = arith.constant 0 : i32
    %c0_i32_0 = arith.constant 0 : i32
    return %c0_i32 : i32
  }
  func.func @transform_1(%arg0: i32, %arg1: i32) -> (i32, i32) {
    %c1_i32 = arith.constant 1 : i32
    %0 = arith.muli %arg0, %c1_i32 : i32
    %1 = arith.addi %0, %arg1 : i32
    %c0_i32 = arith.constant 0 : i32
    %2 = arith.minsi %1, %c0_i32 : i32
    %c0_i32_0 = arith.constant 0 : i32
    %c0_i32_1 = arith.constant 0 : i32
    return %2, %c0_i32_0 : i32, i32
  }
  func.func @transform_2(%arg0: i32, %arg1: i32) -> (i32, i32) {
    %c1_i32 = arith.constant 1 : i32
    %0 = arith.muli %arg0, %c1_i32 : i32
    %1 = arith.addi %0, %arg1 : i32
    %c0_i32 = arith.constant 0 : i32
    %2 = arith.minsi %1, %c0_i32 : i32
    %c0_i32_0 = arith.constant 0 : i32
    %c0_i32_1 = arith.constant 0 : i32
    return %2, %c0_i32_0 : i32, i32
  }
  func.func @transform_3(%arg0: i32, %arg1: i32) -> (i32, i32, i32) {
    %c0_i32 = arith.constant 0 : i32
    %c0_i32_0 = arith.constant 0 : i32
    %c0_i32_1 = arith.constant 0 : i32
    return %arg0, %c0_i32, %c0_i32_0 : i32, i32, i32
  }
}

</mosaic_0001>

<bundles_post_ra>
// kernel: tpu_custom_call.1
= control target key start
LH: loop header
LB: loop body
LE: loop exit
PB: predicated region body
PF: predicated region fallthrough
CT: control target
= control target key end

     0   :  { %8 = vsyncpa [#allocation5], 0  ;;  %s248_s0 = inlined_call_operand.hbm [shape: f32[2], index: 0, kind: input, shape index: {}]   ;;  %s249_s1 = inlined_call_operand.vmem [shape: f32[1,128], index: 1, kind: input, shape index: {}]   ;;  %s250_s2 = inlined_call_operand.vmem [shape: f32[1,128], index: 2, kind: input, shape index: {}]   ;;  %s251_s3 = inlined_call_operand.hbm [shape: f32[1,1,1], index: 3, kind: output, shape index: {}]  }
   0x1   :  { %9 = vsyncpa [#allocation4], 0  ;;  %s159_s14 = scalar_lea.hbm %s248_s0, 16 }
   0x2   :  { %p160_p0 = scmp.ne.s32.totalorder %s248_s0, %s159_s14  ;;  %p163_p1 = scmp.lt.u32.totalorder %s159_s14, %s248_s0 }
   0x4   :  { %p165_p2 = pnand %p163_p1, %p160_p0 }
   0x6   :  { %168 = shalt.err (!%p165_p2)
}
   0x7   :  { %s195_s19 = smov [#allocation3]  }
   0x8   :  { %17 = dma.hbm_to_smem %s248_s0, 16, %s195_s19, [#allocation5]  }
   0x9   :  { %191 = dma.done.wait [#allocation5], 16  }
   0xa   :  { %192 = vsyncadd [#allocation5], 4294967280 }
   0xb   :  { %43 = sfence }
   0xc   :  { %s79_s22 = sld [smem:[#allocation3]]  ;;  %s153_s23 = sld [smem:[#allocation3 + $0x1]]  ;;  %v196_v0 = vmov 0.0   ;;  %v83_v1 = vld [vmem:[%s249_s1] sm:$0x1]  ;;  %vm118_vm0 = vcmask 1040384  }
   0xd   :  { %78 = vst [vmem:[#allocation2] sm:$0x1] %v196_v0  ;;  %v84_v2 = vld [vmem:[%s250_s2] sm:$0x1]  ;;  %s197_s0 = smov [#allocation6]   ;;  %vm130_vm1 = vcmask 0  }
   0xe   :  { %v85_v3 = vsub.f32 %v84_v2, %v83_v1  ;;  %s138_s1 = sshll.u32 %s197_s0, 4  ;;  %s139_s1 = int_to_ptr.vmem [resolvable:$true] %s138_s1 }
   0xf   :  { %s169_s28 = scalar_lea.vmem %s139_s1, 16  ;;  %s173_s29 = scalar_lea.vmem %s139_s1, 32 }
  0x10   :  { %p170_p3 = scmp.ne.s32.totalorder %s139_s1, %s169_s28  ;;  %p174_p4 = scmp.lt.s32.totalorder %s139_s1, %s139_s1 }
  0x11   :  { %p175_p5 = scmp.lt.s32.totalorder %s173_s29, %s169_s28 }
  0x12   :  { %v86_v4 = vstv %s79_s22  ;;  %v88_v5 = vstv %s153_s23 }
  0x13   :  { %v87_v6 = vmul.f32 %v86_v4, %v85_v3  ;;  %p176_p6 = por %p175_p5, %p174_p4 }
  0x14   :  { %v95_v8 = vld [vmem:[#allocation2] sm:$0x1] }
  0x15   :  { %v89_v7 = vadd.f32 %v88_v5, %v87_v6  ;;  %p177_p7 = pnand %p176_p6, %p170_p3 }
  0x17   :  { %v90_v9 = vmax.f32 %v89_v7, 0.0 }
  0x19   :  { %v97_v10 = vadd.f32 %v95_v8, %v90_v9 }
  0x1b   :  { %98 = vst [vmem:[#allocation2] sm:$0x1] %v97_v10 }
  0x22   :  { %v117_v11 = vld [vmem:[#allocation2] sm:$0x1] }
  0x23   :  { %v119_v12 = vsel %vm118_vm0, %v117_v11, 0.0 }
  0x24   :  { %120 = vadd.xlane.f32.xlu0 %v119_v12 }
  0xb1   :  { %v121_v13 = vpop.xlane.xlu0 %120 }
  0xb2   :  { %v122_v14 = vrot.slane %v121_v13, 4 }
  0xb4   :  { %v123_v15 = vadd.f32 %v122_v14, %v121_v13 }
  0xb6   :  { %v124_v16 = vrot.slane %v123_v15, 2 }
  0xb8   :  { %v125_v17 = vadd.f32 %v124_v16, %v123_v15 }
  0xba   :  { %v126_v18 = vrot.slane %v125_v17, 1 }
  0xbc   :  { %v127_v19 = vadd.f32 %v126_v18, %v125_v17 }
  0xbe   :  { %154 = vpush %v127_v19 }
  0xef   :  { %s155_s2 = spop %154 }
  0xf0   :  { %v129_v20 = vstv %s155_s2 }
  0xf1   :  { %131 = vst.msk [vmem:[#allocation6] sm:$0x1] %vm130_vm1, %v129_v20 }
  0xf2   :  { %180 = shalt.err (!%p177_p7)
}
  0xf3   :  { %s181_s5 = scalar_lea.hbm %s251_s3, 16 }
  0xf4   :  { %p182_p8 = scmp.ne.s32.totalorder %s251_s3, %s181_s5  ;;  %p185_p9 = scmp.lt.u32.totalorder %s181_s5, %s251_s3 }
  0xf6   :  { %p187_p10 = pnand %p185_p9, %p182_p8 }
  0xf8   :  { %190 = shalt.err (!%p187_p10)
}
  0xf9   :  { %141 = dma.vmem_to_hbm [thread:$0]  %s139_s1, 16, %s251_s3, [#allocation4]  }
  0xfa   :  { %193 = dma.done.wait [#allocation4], 16  }
  0xfb   :  { %194 = vsyncadd [#allocation4], 4294967280 }
  0xfc   :  { %145 = vsyncpa [#allocation4], 1 }
  0xfd   :  { %146 = vsyncpa [#allocation5], 1 }

</bundles_post_ra>
